<compile_context>
chip_gen: v7x
topology: tpu7x:2x2x1
jax: 0.10.0
libtpu: 0.0.40
codegen_flags: <defaults>
</compile_context>

<pallas_src>
import math

import jax
import jax.numpy as jnp
from jax.experimental import pallas as pl
from jax.experimental.pallas import tpu as pltpu

_INV_SQRT2 = 1.0 / math.sqrt(2.0)


def _gelu(x):
    # exact (erf) GELU, matching torch.nn.GELU() / F.gelu(approximate='none')
    return 0.5 * x * (1.0 + jax.lax.erf(x * _INV_SQRT2))


def _full_spec(shape):
    zeros = (0,) * len(shape)
    return pl.BlockSpec(shape, lambda i, _z=zeros: _z)


# ----------------------------------------------------------------------------
# Fused kernel: [conv1d + bias + GELU + maxpool]* -> flatten -> fc1 -> GELU -> fc2
# ----------------------------------------------------------------------------
def _make_fused_kernel(B, layer_meta, H, NC):
    n_layers = len(layer_meta)

    def kernel(*refs):
        # refs layout:
        #   inputs : x, (w_i, b_i)*n_layers, fc1w, fc1b, fc2w, fc2b
        #   outputs: o
        #   scratch: col_i * n_layers, flat
        x_ref = refs[0]
        conv_refs = refs[1 : 1 + 2 * n_layers]
        fc1w_ref, fc1b_ref, fc2w_ref, fc2b_ref = refs[1 + 2 * n_layers : 5 + 2 * n_layers]
        o_ref = refs[5 + 2 * n_layers]
        col_refs = refs[6 + 2 * n_layers : 6 + 3 * n_layers]
        flat_ref = refs[6 + 3 * n_layers]

        h3 = x_ref[...].astype(jnp.float32)  # (B, L, C) channels-last

        for li, m in enumerate(layer_meta):
            K, pad = m["K"], m["pad"]
            L_in, C_in = m["L_in"], m["C_in"]
            L_out, C_out = m["L_out"], m["C_out"]
            pool_k, pool_s, L_pool = m["pool_k"], m["pool_s"], m["L_pool"]
            w_ref = conv_refs[2 * li]      # (K*C_in, C_out) im2col weight
            b_ref = conv_refs[2 * li + 1]  # (1, C_out)
            col_ref = col_refs[li]         # (B, L_out, K*C_in) VMEM scratch

            # --- im2col with implicit zero padding (all in VMEM) ---------------
            col_ref[...] = jnp.zeros((B, L_out, K * C_in), jnp.float32)
            for k in range(K):
                lo = max(0, pad - k)
                hi = min(L_out, L_in + pad - k)
                if hi > lo:
                    col_ref[:, lo:hi, k * C_in:(k + 1) * C_in] = (
                        h3[:, lo + k - pad : hi + k - pad, :]
                    )

            # --- conv as one MXU matmul, batch folded into the M dimension -----
            col2 = col_ref[...].reshape(B * L_out, K * C_in)
            acc = jnp.dot(col2, w_ref[...], preferred_element_type=jnp.float32)
            acc = _gelu(acc + b_ref[...])                 # (B*L_out, C_out)
            acc3 = acc.reshape(B, L_out, C_out)

            if li == n_layers - 1:
                # --- last layer: fused maxpool + flatten straight into VMEM.
                #     Flat order is (l, c); fc1's weight is pre-permuted to match
                #     torch's channel-major .view() order, so no runtime transpose.
                for l in range(L_pool):
                    win = acc3[:, l * pool_s : l * pool_s + pool_k, :]
                    flat_ref[:, l * C_out:(l + 1) * C_out] = jnp.max(win, axis=1)
            else:
                # --- intermediate layer: reshape-based maxpool (pool_k == pool_s)
                trunc = acc3[:, : L_pool * pool_s, :]
                pooled = jnp.max(trunc.reshape(B * L_pool, pool_s, C_out), axis=1)
                h3 = pooled.reshape(B, L_pool, C_out)

        # --- classifier head: fc1 -> GELU -> fc2 --------------------------------
        # TODO(synk): nn.Dropout is identity at inference (eval mode); not emitted.
        flat = flat_ref[...]
        hid = jnp.dot(flat, fc1w_ref[...], preferred_element_type=jnp.float32)
        hid = _gelu(hid + fc1b_ref[...])
        out = jnp.dot(hid, fc2w_ref[...], preferred_element_type=jnp.float32)
        out = out + fc2b_ref[...]
        o_ref[...] = out.astype(o_ref.dtype)

    return kernel


# ----------------------------------------------------------------------------
# One-time parameter preparation (hoisted out of the per-call path)
# ----------------------------------------------------------------------------
def prepare_cnn(conv_params, fc1_w, fc1_b, fc2_w, fc2_b, *,
                input_length, input_channels, pool_k, pool_s):
    """conv_params: list of (w (C_out,C_in,K), b (C_out,), stride, pad) in torch layout."""
    layer_meta = []
    arrays = []
    L, C = input_length, input_channels
    n_layers = len(conv_params)
    # TODO(synk): BatchNorm1d (use_batch_norm=True) path not implemented.
    for (w, b, stride, pad) in conv_params:
        if stride != 1:
            # TODO(synk): conv stride != 1 not implemented in the fused kernel.
            raise NotImplementedError("conv stride != 1 not supported")
        C_out, C_in, K = w.shape
        assert C_in == C
        L_out = (L + 2 * pad - K) // stride + 1
        L_pool = (L_out - pool_k) // pool_s + 1      # PyTorch MaxPool1d floor
        # im2col weight: row index k*C_in + c  holds  w[o, c, k]
        w_col = jnp.transpose(w, (2, 1, 0)).reshape(K * C_in, C_out).astype(jnp.float32)
        arrays += [w_col, b.reshape(1, C_out).astype(jnp.float32)]
        layer_meta.append(dict(K=K, pad=pad, pool_k=pool_k, pool_s=pool_s,
                               L_in=L, C_in=C, L_out=L_out, L_pool=L_pool,
                               C_out=C_out))
        L, C = L_pool, C_out
    if n_layers > 1 and pool_k != pool_s:
        # TODO(synk): intermediate-layer pooling path assumes pool_kernel == pool_stride.
        raise NotImplementedError("pool_kernel_size != pool_stride with >1 conv layer")

    H, F_flat = fc1_w.shape
    assert F_flat == L * C, (F_flat, L, C)
    # torch flatten is channel-major (c, l); kernel flatten is (l, c) -> permute once.
    fc1_w_p = (fc1_w.reshape(H, C, L).transpose(2, 1, 0)
               .reshape(F_flat, H).astype(jnp.float32))
    NC = fc2_w.shape[0]
    arrays += [fc1_w_p, fc1_b.reshape(1, H).astype(jnp.float32),
               fc2_w.T.astype(jnp.float32), fc2_b.reshape(1, NC).astype(jnp.float32)]
    return arrays, layer_meta, H, NC


# ----------------------------------------------------------------------------
# Forward: a single pallas_call for the whole network
# ----------------------------------------------------------------------------
def configurable_cnn_forward(x, prepped_arrays, layer_meta, H, NC):
    B = x.shape[0]
    kernel = _make_fused_kernel(B, layer_meta, H, NC)
    args = [x] + list(prepped_arrays)
    in_specs = [_full_spec(a.shape) for a in args]
    scratch = [pltpu.VMEM((B, m["L_out"], m["K"] * m["C_in"]), jnp.float32)
               for m in layer_meta]
    last = layer_meta[-1]
    scratch.append(pltpu.VMEM((B, last["L_pool"] * last["C_out"]), jnp.float32))
    return pl.pallas_call(
        kernel,
        out_shape=jax.ShapeDtypeStruct((B, NC), x.dtype),
        grid=(1,),
        in_specs=in_specs,
        out_specs=_full_spec((B, NC)),
        scratch_shapes=scratch,
        compiler_params=pltpu.CompilerParams(dimension_semantics=("arbitrary",)),
    )(*args)


# ----------------------------------------------------------------------------
# Pure-JAX reference (no Pallas) for a correctness check
# ----------------------------------------------------------------------------
def _reference_forward(x, conv_params, fc1_w, fc1_b, fc2_w, fc2_b, *, pool_k, pool_s):
    h = jnp.transpose(x, (0, 2, 1))  # (B, C, L)  -- torch layout
    for (w, b, stride, pad) in conv_params:
        B, C_in, L = h.shape
        C_out, _, K = w.shape
        L_out = (L + 2 * pad - K) // stride + 1
        hp = jnp.pad(h, ((0, 0), (0, 0), (pad, pad)))
        out = jnp.zeros((B, C_out, L_out), jnp.float32)
        for k in range(K):
            out = out + jnp.einsum("bcl,oc->bol", hp[:, :, k : k + L_out], w[:, :, k])
        out = _gelu(out + b[None, :, None])
        L_pool = (L_out - pool_k) // pool_s + 1
        wins = jnp.stack([out[:, :, l * pool_s : l * pool_s + pool_k]
                          for l in range(L_pool)], axis=2)
        h = jnp.max(wins, axis=-1)                       # (B, C_out, L_pool)
    flat = h.reshape(h.shape[0], -1)                     # channel-major flatten
    hid = _gelu(flat @ fc1_w.T + fc1_b)
    return hid @ fc2_w.T + fc2_b


if __name__ == "__main__":
    # config equivalent to the torch module
    B = 2
    C_in = L = 16            # params['input_shape'] is both in_channels and length
    C_out, K, stride, pad = 32, 3, 1, 1
    pool_k = pool_s = 2
    L_pool = ((L + 2 * pad - K) // stride + 1 - pool_k) // pool_s + 1
    F_flat = C_out * L_pool
    H, NC = 32, 10

    key = jax.random.PRNGKey(0)
    kx, kcw, kcb, k1w, k1b, k2w, k2b = jax.random.split(key, 7)
    x = jax.random.normal(kx, (B, L, C_in), jnp.float32)
    conv_w = 0.1 * jax.random.normal(kcw, (C_out, C_in, K), jnp.float32)
    conv_b = 0.1 * jax.random.normal(kcb, (C_out,), jnp.float32)
    fc1_w = 0.1 * jax.random.normal(k1w, (H, F_flat), jnp.float32)
    fc1_b = 0.1 * jax.random.normal(k1b, (H,), jnp.float32)
    fc2_w = 0.1 * jax.random.normal(k2w, (NC, H), jnp.float32)
    fc2_b = 0.1 * jax.random.normal(k2b, (NC,), jnp.float32)

    conv_params = [(conv_w, conv_b, stride, pad)]

    # one-time parameter prep (weight layouts / flatten permutation baked in)
    prepped, layer_meta, H_, NC_ = prepare_cnn(
        conv_params, fc1_w, fc1_b, fc2_w, fc2_b,
        input_length=L, input_channels=C_in, pool_k=pool_k, pool_s=pool_s)

    fwd = jax.jit(lambda xx, *ps: configurable_cnn_forward(xx, ps, layer_meta, H_, NC_))
    out = jax.block_until_ready(fwd(x, *prepped))

    ref = _reference_forward(x, conv_params, fc1_w, fc1_b, fc2_w, fc2_b,
                             pool_k=pool_k, pool_s=pool_s)
    assert out.shape == (B, NC)
    if not jnp.allclose(out, ref, rtol=1e-4, atol=1e-4):
        raise AssertionError("Pallas output mismatch vs JAX reference")
    print("KERNEL_OK")
</pallas_src>

<mosaic_0001>
module attributes {stable_mosaic.version = 11 : i64} {
  func.func @kernel(%arg0: i32, %arg1: memref<2x16x16xf32, #tpu.memory_space<vmem>>, %arg2: memref<48x32xf32, #tpu.memory_space<vmem>>, %arg3: memref<1x32xf32, #tpu.memory_space<vmem>>, %arg4: memref<256x32xf32, #tpu.memory_space<vmem>>, %arg5: memref<1x32xf32, #tpu.memory_space<vmem>>, %arg6: memref<32x10xf32, #tpu.memory_space<vmem>>, %arg7: memref<1x10xf32, #tpu.memory_space<vmem>>, %arg8: memref<2x10xf32, #tpu.memory_space<vmem>>, %arg9: memref<2x16x48xf32, #tpu.memory_space<vmem>>, %arg10: memref<2x256xf32, #tpu.memory_space<vmem>>) attributes {dimension_semantics = [#tpu.dimension_semantics<arbitrary>], iteration_bounds = array<i64: 1>, scalar_prefetch = 0 : i64, scratch_operands = 2 : i64, tpu.core_type = #tpu.core_type<tc>, window_params = [{pipeline_mode = #tpu.pipeline_mode<synchronous>, transform_indices = @transform_0, window_bounds = array<i64: 2, 16, 16>}, {pipeline_mode = #tpu.pipeline_mode<synchronous>, transform_indices = @transform_1, window_bounds = array<i64: 48, 32>}, {pipeline_mode = #tpu.pipeline_mode<synchronous>, transform_indices = @transform_2, window_bounds = array<i64: 1, 32>}, {pipeline_mode = #tpu.pipeline_mode<synchronous>, transform_indices = @transform_3, window_bounds = array<i64: 256, 32>}, {pipeline_mode = #tpu.pipeline_mode<synchronous>, transform_indices = @transform_4, window_bounds = array<i64: 1, 32>}, {pipeline_mode = #tpu.pipeline_mode<synchronous>, transform_indices = @transform_5, window_bounds = array<i64: 32, 10>}, {pipeline_mode = #tpu.pipeline_mode<synchronous>, transform_indices = @transform_6, window_bounds = array<i64: 1, 10>}, {pipeline_mode = #tpu.pipeline_mode<synchronous>, transform_indices = @transform_7, window_bounds = array<i64: 2, 10>}]} {
    %c0 = arith.constant 0 : index
    %c0_0 = arith.constant 0 : index
    %c0_1 = arith.constant 0 : index
    %0 = vector.load %arg1[%c0, %c0_0, %c0_1] : memref<2x16x16xf32, #tpu.memory_space<vmem>>, vector<2x16x16xf32>
    %cst = arith.constant 0.000000e+00 : f32
    %1 = vector.broadcast %cst : f32 to vector<2x16x48xf32>
    %c0_2 = arith.constant 0 : index
    %c0_3 = arith.constant 0 : index
    %c0_4 = arith.constant 0 : index
    %2 = vector.load %arg9[%c0_2, %c0_3, %c0_4] : memref<2x16x48xf32, #tpu.memory_space<vmem>>, vector<2x16x48xf32>
    tpu.vector_store %arg9[%c0_2, %c0_3, %c0_4], %1 {strides = array<i32>} : memref<2x16x48xf32, #tpu.memory_space<vmem>>, vector<2x16x48xf32>,
    %3 = vector.extract_strided_slice %0 {offsets = [0, 0, 0], sizes = [2, 15, 16], strides = [1, 1, 1]} : vector<2x16x16xf32> to vector<2x15x16xf32>
    %c0_5 = arith.constant 0 : index
    %c1 = arith.constant 1 : index
    %c0_6 = arith.constant 0 : index
    %4 = vector.load %arg9[%c0_5, %c1, %c0_6] : memref<2x16x48xf32, #tpu.memory_space<vmem>>, vector<2x15x16xf32>
    tpu.vector_store %arg9[%c0_5, %c1, %c0_6], %3 {strides = array<i32>} : memref<2x16x48xf32, #tpu.memory_space<vmem>>, vector<2x15x16xf32>,
    %c0_7 = arith.constant 0 : index
    %c0_8 = arith.constant 0 : index
    %c16 = arith.constant 16 : index
    %5 = vector.load %arg9[%c0_7, %c0_8, %c16] : memref<2x16x48xf32, #tpu.memory_space<vmem>>, vector<2x16x16xf32>
    tpu.vector_store %arg9[%c0_7, %c0_8, %c16], %0 {strides = array<i32>} : memref<2x16x48xf32, #tpu.memory_space<vmem>>, vector<2x16x16xf32>,
    %6 = vector.extract_strided_slice %0 {offsets = [0, 1, 0], sizes = [2, 15, 16], strides = [1, 1, 1]} : vector<2x16x16xf32> to vector<2x15x16xf32>
    %c0_9 = arith.constant 0 : index
    %c0_10 = arith.constant 0 : index
    %c32 = arith.constant 32 : index
    %7 = vector.load %arg9[%c0_9, %c0_10, %c32] : memref<2x16x48xf32, #tpu.memory_space<vmem>>, vector<2x15x16xf32>
    tpu.vector_store %arg9[%c0_9, %c0_10, %c32], %6 {strides = array<i32>} : memref<2x16x48xf32, #tpu.memory_space<vmem>>, vector<2x15x16xf32>,
    %c0_11 = arith.constant 0 : index
    %c0_12 = arith.constant 0 : index
    %c0_13 = arith.constant 0 : index
    %8 = vector.load %arg9[%c0_11, %c0_12, %c0_13] : memref<2x16x48xf32, #tpu.memory_space<vmem>>, vector<2x16x48xf32>
    %9 = vector.shape_cast %8 : vector<2x16x48xf32> to vector<32x48xf32>
    %c0_14 = arith.constant 0 : index
    %c0_15 = arith.constant 0 : index
    %10 = vector.load %arg2[%c0_14, %c0_15] : memref<48x32xf32, #tpu.memory_space<vmem>>, vector<48x32xf32>
    %cst_16 = arith.constant dense<0.000000e+00> : vector<32x32xf32>
    %11 = tpu.matmul %9, %10, %cst_16 {dimension_numbers = #tpu.dot_dimension_numbers<[1], [0], [0], [1], [0, 0, 1, 1], [], []>} : vector<32x48xf32>, vector<48x32xf32>, vector<32x32xf32> -> vector<32x32xf32>
    %c0_17 = arith.constant 0 : index
    %c0_18 = arith.constant 0 : index
    %12 = vector.load %arg3[%c0_17, %c0_18] : memref<1x32xf32, #tpu.memory_space<vmem>>, vector<1x32xf32>
    %13 = vector.broadcast %12 : vector<1x32xf32> to vector<32x32xf32>
    %14 = arith.addf %11, %13 : vector<32x32xf32>
    %cst_19 = arith.constant 5.000000e-01 : f32
    %15 = vector.broadcast %cst_19 : f32 to vector<32x32xf32>
    %16 = arith.mulf %15, %14 : vector<32x32xf32>
    %cst_20 = arith.constant 0.707106769 : f32
    %17 = vector.broadcast %cst_20 : f32 to vector<32x32xf32>
    %18 = arith.mulf %14, %17 : vector<32x32xf32>
    %19 = math.erf %18 : vector<32x32xf32>
    %cst_21 = arith.constant 1.000000e+00 : f32
    %20 = vector.broadcast %cst_21 : f32 to vector<32x32xf32>
    %21 = arith.addf %20, %19 : vector<32x32xf32>
    %22 = arith.mulf %16, %21 : vector<32x32xf32>
    %23 = vector.shape_cast %22 : vector<32x32xf32> to vector<2x16x32xf32>
    %24 = vector.extract_strided_slice %23 {offsets = [0, 0, 0], sizes = [2, 2, 32], strides = [1, 1, 1]} : vector<2x16x32xf32> to vector<2x2x32xf32>
    %cst_22 = arith.constant dense<0xFF800000> : vector<2x32xf32>
    %25 = vector.multi_reduction <maximumf>, %24, %cst_22 [1] : vector<2x2x32xf32> to vector<2x32xf32>
    %c0_23 = arith.constant 0 : index
    %c0_24 = arith.constant 0 : index
    %26 = vector.load %arg10[%c0_23, %c0_24] : memref<2x256xf32, #tpu.memory_space<vmem>>, vector<2x32xf32>
    tpu.vector_store %arg10[%c0_23, %c0_24], %25 {strides = array<i32>} : memref<2x256xf32, #tpu.memory_space<vmem>>, vector<2x32xf32>,
    %27 = vector.extract_strided_slice %23 {offsets = [0, 2, 0], sizes = [2, 2, 32], strides = [1, 1, 1]} : vector<2x16x32xf32> to vector<2x2x32xf32>
    %cst_25 = arith.constant dense<0xFF800000> : vector<2x32xf32>
    %28 = vector.multi_reduction <maximumf>, %27, %cst_25 [1] : vector<2x2x32xf32> to vector<2x32xf32>
    %c0_26 = arith.constant 0 : index
    %c32_27 = arith.constant 32 : index
    %29 = vector.load %arg10[%c0_26, %c32_27] : memref<2x256xf32, #tpu.memory_space<vmem>>, vector<2x32xf32>
    tpu.vector_store %arg10[%c0_26, %c32_27], %28 {strides = array<i32>} : memref<2x256xf32, #tpu.memory_space<vmem>>, vector<2x32xf32>,
    %30 = vector.extract_strided_slice %23 {offsets = [0, 4, 0], sizes = [2, 2, 32], strides = [1, 1, 1]} : vector<2x16x32xf32> to vector<2x2x32xf32>
    %cst_28 = arith.constant dense<0xFF800000> : vector<2x32xf32>
    %31 = vector.multi_reduction <maximumf>, %30, %cst_28 [1] : vector<2x2x32xf32> to vector<2x32xf32>
    %c0_29 = arith.constant 0 : index
    %c64 = arith.constant 64 : index
    %32 = vector.load %arg10[%c0_29, %c64] : memref<2x256xf32, #tpu.memory_space<vmem>>, vector<2x32xf32>
    tpu.vector_store %arg10[%c0_29, %c64], %31 {strides = array<i32>} : memref<2x256xf32, #tpu.memory_space<vmem>>, vector<2x32xf32>,
    %33 = vector.extract_strided_slice %23 {offsets = [0, 6, 0], sizes = [2, 2, 32], strides = [1, 1, 1]} : vector<2x16x32xf32> to vector<2x2x32xf32>
    %cst_30 = arith.constant dense<0xFF800000> : vector<2x32xf32>
    %34 = vector.multi_reduction <maximumf>, %33, %cst_30 [1] : vector<2x2x32xf32> to vector<2x32xf32>
    %c0_31 = arith.constant 0 : index
    %c96 = arith.constant 96 : index
    %35 = vector.load %arg10[%c0_31, %c96] : memref<2x256xf32, #tpu.memory_space<vmem>>, vector<2x32xf32>
    tpu.vector_store %arg10[%c0_31, %c96], %34 {strides = array<i32>} : memref<2x256xf32, #tpu.memory_space<vmem>>, vector<2x32xf32>,
    %36 = vector.extract_strided_slice %23 {offsets = [0, 8, 0], sizes = [2, 2, 32], strides = [1, 1, 1]} : vector<2x16x32xf32> to vector<2x2x32xf32>
    %cst_32 = arith.constant dense<0xFF800000> : vector<2x32xf32>
    %37 = vector.multi_reduction <maximumf>, %36, %cst_32 [1] : vector<2x2x32xf32> to vector<2x32xf32>
    %c0_33 = arith.constant 0 : index
    %c128 = arith.constant 128 : index
    %38 = vector.load %arg10[%c0_33, %c128] : memref<2x256xf32, #tpu.memory_space<vmem>>, vector<2x32xf32>
    tpu.vector_store %arg10[%c0_33, %c128], %37 {strides = array<i32>} : memref<2x256xf32, #tpu.memory_space<vmem>>, vector<2x32xf32>,
    %39 = vector.extract_strided_slice %23 {offsets = [0, 10, 0], sizes = [2, 2, 32], strides = [1, 1, 1]} : vector<2x16x32xf32> to vector<2x2x32xf32>
    %cst_34 = arith.constant dense<0xFF800000> : vector<2x32xf32>
    %40 = vector.multi_reduction <maximumf>, %39, %cst_34 [1] : vector<2x2x32xf32> to vector<2x32xf32>
    %c0_35 = arith.constant 0 : index
    %c160 = arith.constant 160 : index
    %41 = vector.load %arg10[%c0_35, %c160] : memref<2x256xf32, #tpu.memory_space<vmem>>, vector<2x32xf32>
    tpu.vector_store %arg10[%c0_35, %c160], %40 {strides = array<i32>} : memref<2x256xf32, #tpu.memory_space<vmem>>, vector<2x32xf32>,
    %42 = vector.extract_strided_slice %23 {offsets = [0, 12, 0], sizes = [2, 2, 32], strides = [1, 1, 1]} : vector<2x16x32xf32> to vector<2x2x32xf32>
    %cst_36 = arith.constant dense<0xFF800000> : vector<2x32xf32>
    %43 = vector.multi_reduction <maximumf>, %42, %cst_36 [1] : vector<2x2x32xf32> to vector<2x32xf32>
    %c0_37 = arith.constant 0 : index
    %c192 = arith.constant 192 : index
    %44 = vector.load %arg10[%c0_37, %c192] : memref<2x256xf32, #tpu.memory_space<vmem>>, vector<2x32xf32>
    tpu.vector_store %arg10[%c0_37, %c192], %43 {strides = array<i32>} : memref<2x256xf32, #tpu.memory_space<vmem>>, vector<2x32xf32>,
    %45 = vector.extract_strided_slice %23 {offsets = [0, 14, 0], sizes = [2, 2, 32], strides = [1, 1, 1]} : vector<2x16x32xf32> to vector<2x2x32xf32>
    %cst_38 = arith.constant dense<0xFF800000> : vector<2x32xf32>
    %46 = vector.multi_reduction <maximumf>, %45, %cst_38 [1] : vector<2x2x32xf32> to vector<2x32xf32>
    %c0_39 = arith.constant 0 : index
    %c224 = arith.constant 224 : index
    %47 = vector.load %arg10[%c0_39, %c224] : memref<2x256xf32, #tpu.memory_space<vmem>>, vector<2x32xf32>
    tpu.vector_store %arg10[%c0_39, %c224], %46 {strides = array<i32>} : memref<2x256xf32, #tpu.memory_space<vmem>>, vector<2x32xf32>,
    %c0_40 = arith.constant 0 : index
    %c0_41 = arith.constant 0 : index
    %48 = vector.load %arg10[%c0_40, %c0_41] : memref<2x256xf32, #tpu.memory_space<vmem>>, vector<2x256xf32>
    %c0_42 = arith.constant 0 : index
    %c0_43 = arith.constant 0 : index
    %49 = vector.load %arg4[%c0_42, %c0_43] : memref<256x32xf32, #tpu.memory_space<vmem>>, vector<256x32xf32>
    %cst_44 = arith.constant dense<0.000000e+00> : vector<2x32xf32>
    %50 = tpu.matmul %48, %49, %cst_44 {dimension_numbers = #tpu.dot_dimension_numbers<[1], [0], [0], [1], [0, 0, 1, 1], [], []>} : vector<2x256xf32>, vector<256x32xf32>, vector<2x32xf32> -> vector<2x32xf32>
    %c0_45 = arith.constant 0 : index
    %c0_46 = arith.constant 0 : index
    %51 = vector.load %arg5[%c0_45, %c0_46] : memref<1x32xf32, #tpu.memory_space<vmem>>, vector<1x32xf32>
    %52 = vector.broadcast %51 : vector<1x32xf32> to vector<2x32xf32>
    %53 = arith.addf %50, %52 : vector<2x32xf32>
    %cst_47 = arith.constant 5.000000e-01 : f32
    %54 = vector.broadcast %cst_47 : f32 to vector<2x32xf32>
    %55 = arith.mulf %54, %53 : vector<2x32xf32>
    %cst_48 = arith.constant 0.707106769 : f32
    %56 = vector.broadcast %cst_48 : f32 to vector<2x32xf32>
    %57 = arith.mulf %53, %56 : vector<2x32xf32>
    %58 = math.erf %57 : vector<2x32xf32>
    %cst_49 = arith.constant 1.000000e+00 : f32
    %59 = vector.broadcast %cst_49 : f32 to vector<2x32xf32>
    %60 = arith.addf %59, %58 : vector<2x32xf32>
    %61 = arith.mulf %55, %60 : vector<2x32xf32>
    %c0_50 = arith.constant 0 : index
    %c0_51 = arith.constant 0 : index
    %62 = vector.load %arg6[%c0_50, %c0_51] : memref<32x10xf32, #tpu.memory_space<vmem>>, vector<32x10xf32>
    %cst_52 = arith.constant dense<0.000000e+00> : vector<2x10xf32>
    %63 = tpu.matmul %61, %62, %cst_52 {dimension_numbers = #tpu.dot_dimension_numbers<[1], [0], [0], [1], [0, 0, 1, 1], [], []>} : vector<2x32xf32>, vector<32x10xf32>, vector<2x10xf32> -> vector<2x10xf32>
    %c0_53 = arith.constant 0 : index
    %c0_54 = arith.constant 0 : index
    %64 = vector.load %arg7[%c0_53, %c0_54] : memref<1x10xf32, #tpu.memory_space<vmem>>, vector<1x10xf32>
    %65 = vector.broadcast %64 : vector<1x10xf32> to vector<2x10xf32>
    %66 = arith.addf %63, %65 : vector<2x10xf32>
    %c0_55 = arith.constant 0 : index
    %c0_56 = arith.constant 0 : index
    %67 = vector.load %arg8[%c0_55, %c0_56] : memref<2x10xf32, #tpu.memory_space<vmem>>, vector<2x10xf32>
    tpu.vector_store %arg8[%c0_55, %c0_56], %66 {strides = array<i32>} : memref<2x10xf32, #tpu.memory_space<vmem>>, vector<2x10xf32>,
    return
  }
  func.func @transform_0(%arg0: i32) -> (i32, i32, i32) {
    %c0_i32 = arith.constant 0 : i32
    %c0_i32_0 = arith.constant 0 : i32
    %c0_i32_1 = arith.constant 0 : i32
    %c0_i32_2 = arith.constant 0 : i32
    return %c0_i32, %c0_i32_0, %c0_i32_1 : i32, i32, i32
  }
  func.func @transform_1(%arg0: i32) -> (i32, i32) {
    %c0_i32 = arith.constant 0 : i32
    %c0_i32_0 = arith.constant 0 : i32
    %c0_i32_1 = arith.constant 0 : i32
    return %c0_i32, %c0_i32_0 : i32, i32
  }
  func.func @transform_2(%arg0: i32) -> (i32, i32) {
    %c0_i32 = arith.constant 0 : i32
    %c0_i32_0 = arith.constant 0 : i32
    %c0_i32_1 = arith.constant 0 : i32
    return %c0_i32, %c0_i32_0 : i32, i32
  }
  func.func @transform_3(%arg0: i32) -> (i32, i32) {
    %c0_i32 = arith.constant 0 : i32
    %c0_i32_0 = arith.constant 0 : i32
    %c0_i32_1 = arith.constant 0 : i32
    return %c0_i32, %c0_i32_0 : i32, i32
  }
  func.func @transform_4(%arg0: i32) -> (i32, i32) {
    %c0_i32 = arith.constant 0 : i32
    %c0_i32_0 = arith.constant 0 : i32
    %c0_i32_1 = arith.constant 0 : i32
    return %c0_i32, %c0_i32_0 : i32, i32
  }
  func.func @transform_5(%arg0: i32) -> (i32, i32) {
    %c0_i32 = arith.constant 0 : i32
    %c0_i32_0 = arith.constant 0 : i32
    %c0_i32_1 = arith.constant 0 : i32
    return %c0_i32, %c0_i32_0 : i32, i32
  }
  func.func @transform_6(%arg0: i32) -> (i32, i32) {
    %c0_i32 = arith.constant 0 : i32
    %c0_i32_0 = arith.constant 0 : i32
    %c0_i32_1 = arith.constant 0 : i32
    return %c0_i32, %c0_i32_0 : i32, i32
  }
  func.func @transform_7(%arg0: i32) -> (i32, i32) {
    %c0_i32 = arith.constant 0 : i32
    %c0_i32_0 = arith.constant 0 : i32
    %c0_i32_1 = arith.constant 0 : i32
    return %c0_i32, %c0_i32_0 : i32, i32
  }
}

</mosaic_0001>

<bundles_post_ra>
// kernel: _lambda_.1
= control target key start
LH: loop header
LB: loop body
LE: loop exit
PB: predicated region body
PF: predicated region fallthrough
CT: control target
= control target key end

     0   :  { %vm31_vm0 = vcmask 392192   ;;  %vm36_vm1 = vcmask 130048   ;;  %v960_v1 = vmov 0.0   ;;  %s961_s26 = smov 32   ;;  %s962_s27 = smov 16   ;;  %vm38_vm2 = vcmask 129024   ;;  %s1290_s0 = inlined_call_operand.vmem [shape: f32[2,16,16], index: 0, kind: input, shape index: {}]   ;;  %s1291_s1 = inlined_call_operand.vmem [shape: f32[48,32], index: 1, kind: input, shape index: {}]   ;;  %s1292_s2 = inlined_call_operand.vmem [shape: f32[1,32], index: 2, kind: input, shape index: {}]   ;;  %s1293_s3 = inlined_call_operand.vmem [shape: f32[256,32], index: 3, kind: input, shape index: {}]   ;;  %s1294_s4 = inlined_call_operand.vmem [shape: f32[1,32], index: 4, kind: input, shape index: {}]   ;;  %s1295_s5 = inlined_call_operand.vmem [shape: f32[32,10], index: 5, kind: input, shape index: {}]   ;;  %s1296_s6 = inlined_call_operand.vmem [shape: f32[1,10], index: 6, kind: input, shape index: {}]   ;;  %s1297_s7 = inlined_call_operand.hbm [shape: f32[2,10], index: 7, kind: output, shape index: {}]  }
   0x1   :  { %v27_v0 = vld [vmem:[%s1290_s0] sm:$0xff]  ;;  %32 = vst.msk [vmem:[#allocation2] sm:$0xff] %vm31_vm0, %v960_v1  ;;  %33 = vst.msk [vmem:[#allocation2 + $0x8] sm:$0xff] %vm31_vm0, %v960_v1  ;;  %v28_v2 = vld [vmem:[%s1290_s0 + $0x8] sm:$0xff] }
   0x2   :  { %63 = vrot.lane.b32.xlu1 %v27_v0, %s961_s26  ;;  %34 = vst.msk [vmem:[#allocation2 + $0x10] sm:$0xff] %vm31_vm0, %v960_v1  ;;  %35 = vst.msk [vmem:[#allocation2 + $0x18] sm:$0xff] %vm31_vm0, %v960_v1  ;;  %46 = vrot.lane.b32.xlu0 %v27_v0, %s962_s27  ;;  %v30_v3 = vld [vmem:[%s1290_s0 + $0x18] sm:$0xff]  ;;  %v29_v4 = vld [vmem:[%s1290_s0 + $0x10] sm:$0xff] }
   0x3   :  { %37 = vst.msk [vmem:[#allocation2 + $0x1] sm:$0xff] %vm36_vm1, %v27_v0  ;;  %v85_v5 = vld [vmem:[%s1291_s1] sm:$0xff]  ;;  %v86_v6 = vld [vmem:[%s1291_s1 + $0x8] sm:$0xff]  ;;  %40 = vst.msk [vmem:[#allocation2 + $0x11] sm:$0xff] %vm36_vm1, %v29_v4 }
   0x4   :  { %39 = vst.msk [vmem:[#allocation2 + $0x9] sm:$0x7f] %vm38_vm2, %v28_v2  ;;  %41 = vst.msk [vmem:[#allocation2 + $0x19] sm:$0x7f] %vm38_vm2, %v30_v3  ;;  %v867_v7 = vpack.c.bf16 %v86_v6, %v85_v5  ;;  %v87_v8 = vld [vmem:[%s1291_s1 + $0x10] sm:$0xff]  ;;  %v88_v9 = vld [vmem:[%s1291_s1 + $0x18] sm:$0xff] }
   0x5   :  { %v871_v10 = vpack.c.bf16 %v88_v9, %v87_v8 }
   0x6   :  { %12 = vsyncpa [#allocation5], 0  ;;  %65 = vrot.lane.b32.xlu1 %v28_v2, %s961_s26  ;;  %48 = vrot.lane.b32.xlu0 %v28_v2, %s962_s27  ;;  %v89_v11 = vld [vmem:[%s1291_s1 + $0x20] sm:$0xff]  ;;  %v90_v12 = vld [vmem:[%s1291_s1 + $0x28] sm:$0xff]  ;;  %vm58_vm3 = vcmask 261248   ;;  %vm75_vm4 = vcmask 392449   ;;  %v235_v60 = vlaneseq }
   0x7   :  { %868 = vmatprep.subr.bf16.mxu0 %v867_v7  ;;  %v875_v13 = vpack.c.bf16 %v90_v12, %v89_v11  ;;  %vm77_vm5 = vcmask 392448   ;;  %v569_v26 = vld [vmem:[%s1293_s3 + $0x80] sm:$0xff]  ;;  %v570_v27 = vld [vmem:[%s1293_s3 + $0x88] sm:$0xff]  ;;  %v571_v31 = vld [vmem:[%s1293_s3 + $0x90] sm:$0xff]  ;;  %vm215_vm6 = vcmask 254976   ;;  %vm261_vm7 = vcmask 257026  }
   0x8   :  { %870 = vmatpush3.bf16.msra.mxu0 %v867_v7  ;;  %v553_v28 = vld [vmem:[%s1293_s3] sm:$0xff]  ;;  %v879_v29 = vpack.c.bf16 %v570_v27, %v569_v26  ;;  %v554_v30 = vld [vmem:[%s1293_s3 + $0x8] sm:$0xff]  ;;  %v572_v32 = vld [vmem:[%s1293_s3 + $0x98] sm:$0xff]  ;;  %v963_v58 = vmov 1983009808   ;;  %vm304_vm8 = vcmask 259076  }
   0x9   :  { %872 = vmatprep.subr.bf16.mxu0 %v871_v10  ;;  %v881_v33 = vpack.c.bf16 %v554_v30, %v553_v28  ;;  %v883_v34 = vpack.c.bf16 %v572_v32, %v571_v31  ;;  %v555_v35 = vld [vmem:[%s1293_s3 + $0x10] sm:$0xff]  ;;  %v556_v36 = vld [vmem:[%s1293_s3 + $0x18] sm:$0xff]  ;;  %v573_v37 = vld [vmem:[%s1293_s3 + $0xa0] sm:$0xff]  ;;  %v233_v59 = vunpack.c.l.s4 %v963_v58  ;;  %vm347_vm9 = vcmask 261126   ;;  %s964_s12 = smov 64   ;;  %s965_s19 = smov 96  }
   0xa   :  { %52 = vrot.lane.b32.xlu1 %v30_v3, %s962_s27  ;;  %50 = vrot.lane.b32.xlu0 %v29_v4, %s962_s27  ;;  %v574_v38 = vld [vmem:[%s1293_s3 + $0xa8] sm:$0xff]  ;;  %v885_v39 = vpack.c.bf16 %v556_v36, %v555_v35  ;;  %v557_v41 = vld [vmem:[%s1293_s3 + $0x20] sm:$0xff]  ;;  %v236_v6 = vshrl.u32 %v235_v60, 7  ;;  %vm251_vm10 = vcmask 1041409   ;;  %vm253_vm11 = vcmask 1043459  }
   0xb   :  { %880 = vmatprep.subr.bf16.mxu1 %v879_v29  ;;  %v887_v40 = vpack.c.bf16 %v574_v38, %v573_v37  ;;  %v558_v42 = vld [vmem:[%s1293_s3 + $0x28] sm:$0xff]  ;;  %v779_v44 = vld [vmem:[%s1292_s2] ss:$0 sm:$0xff]  ;;  %v234_v5 = vunpack.c.0.s8 %v233_v59  ;;  %vm255_vm12 = vcmask 1045509   ;;  %vm257_vm13 = vcmask 1047559   ;;  %s968_s2 = smov [#allocation4]  }
   0xc   :  { %874 = vmatpush3.bf16.msra.mxu0 %v871_v10  ;;  %882 = vmatpush3.bf16.msra.mxu1 %v881_v33  ;;  %v889_v43 = vpack.c.bf16 %v558_v42, %v557_v41  ;;  %vm302_vm14 = vcmask 517376   ;;  %vm345_vm15 = vcmask 779776   ;;  %vm967_vm1 = vmmov 0   ;;  %s771_s23 = sshll.u32 %s968_s2, 4  ;;  %s772_s23 = int_to_ptr.vmem [resolvable:$true] %s771_s23 }
   0xd   :  { %876 = vmatprep.subr.bf16.mxu0 %v875_v13  ;;  %884 = vmatprep.subr.bf16.mxu1 %v883_v34  ;;  %vm689_vm2 = vcmask 261120   ;;  %p941_p1 = scmp.lt.s32.totalorder %s772_s23, %s772_s23 }
   0xe   :  { %69 = vrot.lane.b32.xlu1 %v30_v3, %s961_s26  ;;  %67 = vrot.lane.b32.xlu0 %v29_v4, %s961_s26 }
  0x10   :  { %878 = vmatpush3.bf16.msra.mxu0 %v875_v13  ;;  %886 = vmatpush3.bf16.msra.mxu1 %v885_v39 }
  0x11   :  { %888 = vmatprep.subr.bf16.mxu1 %v887_v40  ;;  %v1108_v40 = vsub.s32 %v234_v5, %v236_v6 }
  0x14   :  { %890 = vmatpush3.bf16.msra.mxu1 %v889_v43 }
  0x74   :  { %v64_v14 = vpop.permute.xlu1 %63  ;;  %v47_v15 = vpop.permute.xlu0 %46 }
  0x75   :  { %59 = vst.msk [vmem:[#allocation2] sm:$0xff] %vm58_vm3, %v47_v15 }
  0x76   :  { %76 = vst.msk [vmem:[#allocation2 - $0x1] sm:$0xfe] %vm75_vm4, %v64_v14 }
  0x78   :  { %v66_v16 = vpop.permute.xlu1 %65  ;;  %v49_v17 = vpop.permute.xlu0 %48 }
  0x79   :  { %60 = vst.msk [vmem:[#allocation2 + $0x8] sm:$0xff] %vm58_vm3, %v49_v17 }
  0x7a   :  { %78 = vst.msk [vmem:[#allocation2 + $0x7] sm:$0xff] %vm77_vm5, %v66_v16 }
  0x7c   :  { %v53_v18 = vpop.permute.xlu1 %52  ;;  %v51_v19 = vpop.permute.xlu0 %50 }
  0x7d   :  { %62 = vst.msk [vmem:[#allocation2 + $0x18] sm:$0xff] %vm58_vm3, %v53_v18  ;;  %61 = vst.msk [vmem:[#allocation2 + $0x10] sm:$0xff] %vm58_vm3, %v51_v19  ;;  %vm763_vm3 = vcmask 74752  }
  0x80   :  { %v70_v20 = vpop.permute.xlu1 %69  ;;  %v68_v21 = vpop.permute.xlu0 %67 }
  0x81   :  { %80 = vst.msk [vmem:[#allocation2 + $0x17] sm:$0xff] %vm77_vm5, %v70_v20  ;;  %v81_v22 = vld [vmem:[#allocation2] sm:$0xff]  ;;  %v82_v23 = vld [vmem:[#allocation2 + $0x8] sm:$0xff] }
  0x82   :  { %79 = vst.msk [vmem:[#allocation2 + $0xf] sm:$0xfe] %vm75_vm4, %v68_v21  ;;  %850 = vmatprep.mubr.msk.f32.mxu0 %vm31_vm0, %v81_v22 }
  0x83   :  { %851 = vmatmul.mubr.msk.f32.vlgmr.msra.gmra.mrb[0].mxu0 %vm31_vm0, %v82_v23 }
  0x88   :  { %v84_v25 = vld [vmem:[#allocation2 + $0x18] sm:$0xff] }
  0x89   :  { %v83_v24 = vld [vmem:[#allocation2 + $0x10] sm:$0xff] }
  0x8a   :  { %853 = vmatprep.mubr.msk.f32.mxu0 %vm31_vm0, %v83_v24 }
  0x8b   :  { %854 = vmatmul.mubr.msk.f32.gmra.mrb[2].mxu0 %vm31_vm0, %v84_v25  ;;  %vm388_vm0 = vcmask 1042176  }
  0x8c   :  { %864 = vmatprep.mubr.msk.f32.mxu0 %vm967_vm1, %v960_v1  ;;  %v786_v1 = vld [vmem:[%s1296_s6] ss:$0 sm:$0xff] }
 0x156   :  { %v852_v45 = vpop.f32.mrb[0].mxu0 }
 0x157   :  { %v182_v46 = vadd.f32 %v852_v45, %v779_v44  ;;  %v176_v47 = vpop.f32.mrb[1].mxu0 }
 0x158   :  { %v177_v48 = vadd.f32 %v779_v44, %v176_v47 }
 0x159   :  { %v200_v49 = vmul.f32 0.70710677, %v182_v46  ;;  %v196_v62 = vmul.f32 0.5, %v182_v46 }
 0x15a   :  { %v199_v50 = vmul.f32 0.70710677, %v177_v48  ;;  %v195_v0 = vmul.f32 0.5, %v177_v48 }
 0x15b   :  { %926 = verf.f32 %v200_v49 }
 0x15c   :  { %928 = verf.f32 %v199_v50 }
 0x15e   :  { %v855_v51 = vpop.f32.mrb[2].mxu0 }
 0x15f   :  { %v192_v52 = vadd.f32 %v855_v51, %v779_v44  ;;  %v186_v53 = vpop.f32.mrb[3].mxu0 }
 0x160   :  { %v187_v54 = vadd.f32 %v779_v44, %v186_v53 }
 0x161   :  { %v202_v55 = vmul.f32 0.70710677, %v192_v52  ;;  %v198_v39 = vmul.f32 0.5, %v192_v52 }
 0x162   :  { %v201_v56 = vmul.f32 0.70710677, %v187_v54  ;;  %v197_v46 = vmul.f32 0.5, %v187_v54 }
 0x163   :  { %930 = verf.f32 %v202_v55 }
 0x164   :  { %932 = verf.f32 %v201_v56 }
 0x165   :  { %v927_v57 = vpop.eup %926 }
 0x166   :  { %v929_v61 = vpop.eup %928  ;;  %v208_v63 = vadd.f32 1.0, %v927_v57 }
 0x167   :  { %v207_v2 = vadd.f32 1.0, %v929_v61 }
 0x168   :  { %v212_v3 = vmul.f32 %v208_v63, %v196_v62 }
 0x169   :  { %v211_v4 = vmul.f32 %v207_v2, %v195_v0 }
 0x16a   :  { %v390_v7 = vsel %vm215_vm6, %v212_v3, -inf  ;;  %v429_v8 = vsel %vm261_vm7, %v212_v3, -inf  ;;  %v470_v9 = vsel %vm304_vm8, %v212_v3, -inf  ;;  %v511_v10 = vsel %vm347_vm9, %v212_v3, -inf }
 0x16b   :  { %v391_v11 = vrot.slane %v390_v7, 4  ;;  %v430_v12 = vrot.slane %v429_v8, 4  ;;  %v471_v13 = vrot.slane %v470_v9, 4  ;;  %v512_v14 = vrot.slane %v511_v10, 4 }
 0x16c   :  { %v216_v15 = vsel %vm215_vm6, %v211_v4, -inf  ;;  %v262_v16 = vsel %vm261_vm7, %v211_v4, -inf  ;;  %v305_v17 = vsel %vm304_vm8, %v211_v4, -inf  ;;  %v348_v18 = vsel %vm347_vm9, %v211_v4, -inf }
 0x16d   :  { %v392_v19 = vmax.f32 %v390_v7, %v391_v11  ;;  %v431_v20 = vmax.f32 %v429_v8, %v430_v12  ;;  %v472_v21 = vmax.f32 %v470_v9, %v471_v13  ;;  %v513_v22 = vmax.f32 %v511_v10, %v512_v14  ;;  %v931_v27 = vpop.eup %930 }
 0x16e   :  { %v217_v23 = vrot.slane %v216_v15, 4  ;;  %v263_v24 = vrot.slane %v262_v16, 4  ;;  %v306_v25 = vrot.slane %v305_v17, 4  ;;  %v349_v26 = vrot.slane %v348_v18, 4  ;;  %v933_v32 = vpop.eup %932 }
 0x16f   :  { %v393_v28 = vrot.slane %v392_v19, 2  ;;  %v432_v29 = vrot.slane %v431_v20, 2  ;;  %v473_v30 = vrot.slane %v472_v21, 2  ;;  %v514_v31 = vrot.slane %v513_v22, 2 }
 0x170   :  { %v218_v33 = vmax.f32 %v216_v15, %v217_v23  ;;  %v264_v34 = vmax.f32 %v262_v16, %v263_v24  ;;  %v307_v35 = vmax.f32 %v305_v17, %v306_v25  ;;  %v350_v36 = vmax.f32 %v348_v18, %v349_v26 }
 0x171   :  { %v1106_v37 = vmax.f32 %v392_v19, %v393_v28  ;;  %v433_v38 = vmax.f32 %v431_v20, %v432_v29  ;;  %v210_v45 = vadd.f32 1.0, %v931_v27  ;;  %v209_v47 = vadd.f32 1.0, %v933_v32 }
 0x172   :  { %v219_v41 = vrot.slane %v218_v33, 2  ;;  %v265_v42 = vrot.slane %v264_v34, 2  ;;  %v308_v43 = vrot.slane %v307_v35, 2  ;;  %v351_v44 = vrot.slane %v350_v36, 2 }
 0x173   :  { %v434_v48 = vrot.slane %v433_v38, 1  ;;  %v474_v49 = vmax.f32 %v472_v21, %v473_v30  ;;  %v1110_v50 = vmax.f32 %v513_v22, %v514_v31  ;;  %v395_v55 = vrot.slane %v1106_v37, 1 }
 0x174   :  { %v1112_v51 = vmax.f32 %v218_v33, %v219_v41  ;;  %v266_v53 = vmax.f32 %v264_v34, %v265_v42  ;;  %v309_v56 = vmax.f32 %v307_v35, %v308_v43  ;;  %v214_v52 = vmul.f32 %v210_v45, %v198_v39 }
 0x175   :  { %v213_v57 = vmul.f32 %v209_v47, %v197_v46  ;;  %v1116_v59 = vmax.f32 %v350_v36, %v351_v44  ;;  %v1118_v60 = vmax.f32 %v433_v38, %v434_v48  ;;  %v475_v5 = vrot.slane %v474_v49, 1 }
 0x176   :  { %v221_v58 = vrot.slane %v1112_v51, 1  ;;  %v267_v54 = vrot.slane %v266_v53, 1  ;;  %v397_v61 = vsel %vm215_vm6, %v214_v52, -inf  ;;  %v436_v62 = vsel %vm261_vm7, %v214_v52, -inf }
 0x177   :  { %v477_v63 = vsel %vm304_vm8, %v214_v52, -inf  ;;  %v518_v0 = vsel %vm347_vm9, %v214_v52, -inf  ;;  %v398_v2 = vrot.slane %v397_v61, 4  ;;  %v437_v3 = vrot.slane %v436_v62, 4 }
 0x178   :  { %v478_v4 = vrot.slane %v477_v63, 4  ;;  %v519_v6 = vrot.slane %v518_v0, 4  ;;  %v223_v7 = vsel %vm215_vm6, %v213_v57, -inf  ;;  %v269_v8 = vsel %vm261_vm7, %v213_v57, -inf }
 0x179   :  { %v312_v9 = vsel %vm304_vm8, %v213_v57, -inf  ;;  %v399_v10 = vmax.f32 %v397_v61, %v398_v2  ;;  %v438_v11 = vmax.f32 %v436_v62, %v437_v3  ;;  %v224_v13 = vrot.slane %v223_v7, 4 }
 0x17a   :  { %v479_v12 = vmax.f32 %v477_v63, %v478_v4  ;;  %v520_v14 = vmax.f32 %v518_v0, %v519_v6  ;;  %v270_v15 = vrot.slane %v269_v8, 4  ;;  %v313_v16 = vrot.slane %v312_v9, 4 }
 0x17b   :  { %v355_v17 = vsel %vm347_vm9, %v213_v57, -inf  ;;  %v400_v18 = vrot.slane %v399_v10, 2  ;;  %v439_v19 = vrot.slane %v438_v11, 2  ;;  %v225_v21 = vmax.f32 %v223_v7, %v224_v13 }
 0x17c   :  { %v480_v20 = vrot.slane %v479_v12, 2  ;;  %v271_v22 = vmax.f32 %v269_v8, %v270_v15  ;;  %v314_v23 = vmax.f32 %v312_v9, %v313_v16  ;;  %v356_v24 = vrot.slane %v355_v17, 4 }
 0x17d   :  { %v310_v25 = vrot.slane %v309_v56, 1  ;;  %v1128_v26 = vmax.f32 %v399_v10, %v400_v18  ;;  %v521_v27 = vrot.slane %v520_v14, 2  ;;  %v226_v28 = vrot.slane %v225_v21, 2 }
 0x17e   :  { %v440_v29 = vmax.f32 %v438_v11, %v439_v19  ;;  %v272_v30 = vrot.slane %v271_v22, 2  ;;  %v315_v31 = vrot.slane %v314_v23, 2  ;;  %v357_v32 = vmax.f32 %v355_v17, %v356_v24 }
 0x17f   :  { %v268_v33 = vmax.f32 %v266_v53, %v267_v54  ;;  %v451_v35 = vrot.slane %v1118_v60, %v1108_v40  ;;  %v476_v36 = vmax.f32 %v474_v49, %v475_v5  ;;  %v481_v38 = vmax.f32 %v479_v12, %v480_v20 }
 0x180   :  { %v441_v34 = vrot.slane %v440_v29, 1  ;;  %v1132_v39 = vmax.f32 %v225_v21, %v226_v28  ;;  %v358_v41 = vrot.slane %v357_v32, 2  ;;  %v273_v42 = vmax.f32 %v271_v22, %v272_v30  ;;  %v576_v30 = vld [vmem:[%s1293_s3 + $0xb8] sm:$0xff] }
 0x181   :  { %v284_v43 = vrot.slane %v268_v33, %v1108_v40  ;;  %v482_v45 = vrot.slane %v481_v38, 1  ;;  %v311_v46 = vmax.f32 %v309_v56, %v310_v25  ;;  %v316_v47 = vmax.f32 %v314_v23, %v315_v31 }
 0x182   :  { %v442_v44 = vmax.f32 %v440_v29, %v441_v34  ;;  %v274_v48 = vrot.slane %v273_v42, 1  ;;  %v492_v53 = vrot.slane %v476_v36, %v1108_v40  ;;  %v516_v52 = vrot.slane %v1110_v50, 1  ;;  %v575_v29 = vld [vmem:[%s1293_s3 + $0xb0] sm:$0xff] }
 0x183   :  { %v522_v57 = vmax.f32 %v520_v14, %v521_v27  ;;  %v483_v49 = vmax.f32 %v481_v38, %v482_v45  ;;  %v317_v54 = vrot.slane %v316_v47, 1  ;;  %v353_v61 = vrot.slane %v1116_v59, 1 }
 0x184   :  { %v458_v60 = vrot.slane %v442_v44, %v1108_v40  ;;  %v275_v62 = vmax.f32 %v273_v42, %v274_v48  ;;  %v517_v63 = vmax.f32 %v1110_v50, %v516_v52  ;;  %v359_v2 = vmax.f32 %v357_v32, %v358_v41  ;;  %v559_v42 = vld [vmem:[%s1293_s3 + $0x30] sm:$0xff]  ;;  %v577_v48 = vld [vmem:[%s1293_s3 + $0xc0] sm:$0xff] }
 0x185   :  { %v523_v0 = vrot.slane %v522_v57, 1  ;;  %v499_v56 = vrot.slane %v483_v49, %v1108_v40  ;;  %v318_v4 = vmax.f32 %v316_v47, %v317_v54  ;;  %v354_v5 = vmax.f32 %v1116_v59, %v353_v61  ;;  %v561_v49 = vld [vmem:[%s1293_s3 + $0x40] sm:$0xff]  ;;  %v562_v54 = vld [vmem:[%s1293_s3 + $0x48] sm:$0xff] }
 0x186   :  { %v461_v3 = vrot.slane %v458_v60, 7  ;;  %v291_v6 = vrot.slane %v275_v62, %v1108_v40  ;;  %v327_v7 = vrot.slane %v311_v46, %v1108_v40  ;;  %v360_v9 = vrot.slane %v359_v2, 1 }
 0x187   :  { %v524_v8 = vmax.f32 %v522_v57, %v523_v0  ;;  %v502_v11 = vrot.slane %v499_v56, 7  ;;  %v334_v12 = vrot.slane %v318_v4, %v1108_v40  ;;  %v533_v50 = vrot.slane %v517_v63, %v1108_v40 }
 0x188   :  { %v462_v10 = vsel %vm251_vm10, %v461_v3, %v451_v35  ;;  %v294_v14 = vrot.slane %v291_v6, 7  ;;  %v361_v16 = vmax.f32 %v359_v2, %v360_v9  ;;  %v370_v19 = vrot.slane %v354_v5, %v1108_v40  ;;  %v579_v2 = vld [vmem:[%s1293_s3 + $0xd0] sm:$0xff] }
 0x189   :  { %v463_v13 = vsel %vm253_vm11, %v461_v3, %v462_v10  ;;  %v540_v15 = vrot.slane %v524_v8, %v1108_v40  ;;  %v503_v17 = vsel %vm251_vm10, %v502_v11, %v492_v53  ;;  %v337_v18 = vrot.slane %v334_v12, 7  ;;  %v578_v53 = vld [vmem:[%s1293_s3 + $0xc8] sm:$0xff]  ;;  %v581_v10 = vld [vmem:[%s1293_s3 + $0xe0] sm:$0xff] }
 0x18a   :  { %v464_v59 = vsel %vm255_vm12, %v461_v3, %v463_v13  ;;  %v295_v21 = vsel %vm251_vm10, %v294_v14, %v284_v43  ;;  %v504_v22 = vsel %vm253_vm11, %v502_v11, %v503_v17  ;;  %v377_v28 = vrot.slane %v361_v16, %v1108_v40  ;;  %v560_v43 = vld [vmem:[%s1293_s3 + $0x38] sm:$0xff]  ;;  %v565_v17 = vld [vmem:[%s1293_s3 + $0x60] sm:$0xff] }
 0x18b   :  { %v465_v20 = vsel %vm257_vm13, %v461_v3, %v464_v59  ;;  %v543_v23 = vrot.slane %v540_v15, 7  ;;  %v296_v24 = vsel %vm253_vm11, %v294_v14, %v295_v21  ;;  %v505_v25 = vsel %vm255_vm12, %v502_v11, %v504_v22  ;;  %v580_v3 = vld [vmem:[%s1293_s3 + $0xd8] sm:$0xff] }
 0x18c   :  { %466 = vrot.lane.b32.xlu1 %v465_v20, %s961_s26  ;;  %v338_v27 = vsel %vm251_vm10, %v337_v18, %v327_v7  ;;  %v297_v31 = vsel %vm255_vm12, %v294_v14, %v296_v24  ;;  %v506_v32 = vsel %vm257_vm13, %v502_v11, %v505_v25  ;;  %v380_v41 = vrot.slane %v377_v28, 7  ;;  %v582_v11 = vld [vmem:[%s1293_s3 + $0xe8] sm:$0xff]  ;;  %v583_v20 = vld [vmem:[%s1293_s3 + $0xf0] sm:$0xff]  ;;  %v584_v21 = vld [vmem:[%s1293_s3 + $0xf8] sm:$0xff] }
 0x18d   :  { %v339_v33 = vsel %vm253_vm11, %v337_v18, %v338_v27  ;;  %v544_v34 = vsel %vm251_vm10, %v543_v23, %v533_v50  ;;  %v298_v35 = vsel %vm257_vm13, %v294_v14, %v297_v31  ;;  %v402_v46 = vrot.slane %v1128_v26, 1  ;;  %v567_v28 = vld [vmem:[%s1293_s3 + $0x70] sm:$0xff] }
 0x18e   :  { %v340_v36 = vsel %vm255_vm12, %v337_v18, %v339_v33  ;;  %v545_v38 = vsel %vm253_vm11, %v543_v23, %v544_v34  ;;  %299 = vrot.lane.b32.xlu0 %v298_v35, %s961_s26  ;;  %v891_v47 = vpack.c.bf16 %v576_v30, %v575_v29  ;;  %v381_v57 = vsel %vm251_vm10, %v380_v41, %v370_v19  ;;  %v568_v29 = vld [vmem:[%s1293_s3 + $0x78] sm:$0xff] }
 0x18f   :  { %v341_v44 = vsel %vm257_vm13, %v337_v18, %v340_v36  ;;  %v546_v45 = vsel %vm255_vm12, %v543_v23, %v545_v38  ;;  %v228_v60 = vrot.slane %v1132_v39, 1  ;;  %v396_v61 = vmax.f32 %v1106_v37, %v395_v55  ;;  %v566_v18 = vld [vmem:[%s1293_s3 + $0x68] sm:$0xff] }
 0x190   :  { %507 = vrot.lane.b32.xlu1 %v506_v32, %s964_s12  ;;  %v547_v52 = vsel %vm257_vm13, %v543_v23, %v546_v45  ;;  %v382_v62 = vsel %vm253_vm11, %v380_v41, %v381_v57  ;;  %v403_v63 = vmax.f32 %v1128_v26, %v402_v46  ;;  %892 = vmatprep.subr.bf16.mxu1 %v891_v47  ;;  %v966_v45 = vmov 0.0|0.0   ;;  %v681_v47 = vld [vmem:[%s1295_s5 + $0x18] sm:$0xff] }
 0x191   :  { %v893_v0 = vpack.c.bf16 %v560_v43, %v559_v42  ;;  %v222_v56 = vmax.f32 %v1112_v51, %v221_v58  ;;  %v383_v37 = vsel %vm255_vm12, %v380_v41, %v382_v62  ;;  %v229_v55 = vmax.f32 %v1132_v39, %v228_v60  ;;  %v563_v51 = vld [vmem:[%s1293_s3 + $0x50] sm:$0xff]  ;;  %v564_v58 = vld [vmem:[%s1293_s3 + $0x58] sm:$0xff]  ;;  %v678_v42 = vld [vmem:[%s1295_s5] sm:$0xff]  ;;  %911 = vmatprep.subr.bf16.mxu0 %v966_v45 }
 0x192   :  { %v895_v4 = vpack.c.bf16 %v578_v53, %v577_v48  ;;  %342 = vrot.lane.b32.xlu0 %v341_v44, %s964_s12  ;;  %v384_v26 = vsel %vm257_vm13, %v380_v41, %v383_v37  ;;  %v419_v5 = vrot.slane %v403_v63, %v1108_v40  ;;  %v897_v6 = vpack.c.bf16 %v562_v54, %v561_v49  ;;  %v679_v43 = vld [vmem:[%s1295_s5 + $0x8] sm:$0xff]  ;;  %v680_v44 = vld [vmem:[%s1295_s5 + $0x10] sm:$0xff] }
 0x193   :  { %894 = vmatpush3.bf16.msra.mxu1 %v893_v0  ;;  %v245_v7 = vrot.slane %v229_v55, %v1108_v40  ;;  %v899_v8 = vpack.c.bf16 %v580_v3, %v579_v2  ;;  %v412_v39 = vrot.slane %v396_v61, %v1108_v40  ;;  %v238_v50 = vrot.slane %v222_v56, %v1108_v40 }
 0x194   :  { %548 = vrot.lane.b32.xlu1 %v547_v52, %s965_s19  ;;  %896 = vmatprep.subr.bf16.mxu1 %v895_v4  ;;  %v422_v9 = vrot.slane %v419_v5, 7  ;;  %v901_v14 = vpack.c.bf16 %v564_v58, %v563_v51  ;;  %v903_v59 = vpack.c.bf16 %v582_v11, %v581_v10  ;;  %v905_v25 = vpack.c.bf16 %v566_v18, %v565_v17  ;;  %v784_v52 = vld [vmem:[%s1294_s4] ss:$0 sm:$0xff]  ;;  %s936_s4 = scalar_lea.vmem %s772_s23, 32 }
 0x195   :  { %v250_v12 = vrot.slane %v245_v7, 7  ;;  %v907_v27 = vpack.c.bf16 %v584_v21, %v583_v20  ;;  %v909_v30 = vpack.c.bf16 %v568_v29, %v567_v28  ;;  %v912_v46 = vpack.c.bf16 %v679_v43, %v678_v42  ;;  %p937_p0 = scmp.ne.s32.totalorder %s772_s23, %s936_s4  ;;  %p942_p2 = scmp.lt.s32.totalorder %s936_s4, %s936_s4 }
 0x196   :  { %385 = vrot.lane.b32.xlu0 %v384_v26, %s965_s19  ;;  %v423_v13 = vsel %vm251_vm10, %v422_v9, %v412_v39  ;;  %v915_v48 = vpack.c.bf16 %v681_v47, %v680_v44 }
 0x197   :  { %898 = vmatpush3.bf16.msra.mxu1 %v897_v6  ;;  %v424_v15 = vsel %vm253_vm11, %v422_v9, %v423_v13  ;;  %v252_v16 = vsel %vm251_vm10, %v250_v12, %v238_v50  ;;  %913 = vmatpush3.bf16.msra.mxu0 %v912_v46  ;;  %p943_p3 = por %p942_p2, %p941_p1 }
 0x198   :  { %900 = vmatprep.subr.bf16.mxu1 %v899_v8  ;;  %v425_v40 = vsel %vm255_vm12, %v422_v9, %v424_v15  ;;  %v254_v19 = vsel %vm253_vm11, %v250_v12, %v252_v16  ;;  %914 = vmatprep.subr.bf16.mxu0 %v966_v45 }
 0x199   :  { %v426_v22 = vsel %vm257_vm13, %v422_v9, %v425_v40  ;;  %v256_v23 = vsel %vm255_vm12, %v250_v12, %v254_v19  ;;  %p944_p4 = pnand %p943_p3, %p937_p0 }
 0x19a   :  { %428 = vst.msk [vmem:[#allocation3 + $0x2] sm:$0x3] %vm215_vm6, %v426_v22  ;;  %v258_v24 = vsel %vm257_vm13, %v250_v12, %v256_v23 }
 0x19b   :  { %902 = vmatpush3.bf16.msra.mxu1 %v901_v14  ;;  %260 = vst.msk [vmem:[#allocation3] sm:$0x3] %vm215_vm6, %v258_v24  ;;  %916 = vmatpush3.bf16.msra.mxu0 %v915_v48 }
 0x19c   :  { %904 = vmatprep.subr.bf16.mxu1 %v903_v59 }
 0x19f   :  { %906 = vmatpush3.bf16.msra.mxu1 %v905_v25 }
 0x1a0   :  { %908 = vmatprep.subr.bf16.mxu1 %v907_v27 }
 0x1a3   :  { %910 = vmatpush3.bf16.msra.mxu1 %v909_v30 }
 0x1fe   :  { %v467_v31 = vpop.permute.xlu1 %466 }
 0x1ff   :  { %469 = vst.msk [vmem:[#allocation3 + $0x2] sm:$0x3] %vm302_vm14, %v467_v31 }
 0x200   :  { %v300_v32 = vpop.permute.xlu0 %299 }
 0x201   :  { %303 = vst.msk [vmem:[#allocation3] sm:$0x3] %vm302_vm14, %v300_v32 }
 0x202   :  { %v508_v33 = vpop.permute.xlu1 %507 }
 0x203   :  { %510 = vst.msk [vmem:[#allocation3 + $0x2] sm:$0x3] %vm345_vm15, %v508_v33 }
 0x204   :  { %v343_v34 = vpop.permute.xlu0 %342 }
 0x205   :  { %346 = vst.msk [vmem:[#allocation3] sm:$0x3] %vm345_vm15, %v343_v34 }
 0x206   :  { %v549_v35 = vpop.permute.xlu1 %548 }
 0x207   :  { %551 = vst.msk [vmem:[#allocation3 + $0x2] sm:$0x3] %vm388_vm0, %v549_v35 }
 0x208   :  { %v386_v36 = vpop.permute.xlu0 %385 }
 0x209   :  { %389 = vst.msk [vmem:[#allocation3] sm:$0x3] %vm388_vm0, %v386_v36 }
 0x210   :  { %v785_v38 = vld.sshfl [vmem:[#allocation3] sm:$0x33 pattern:$0x76325410] }
 0x211   :  { %v600_v41 = vcombine.high %v785_v38, %v785_v38 }
 0x213   :  { %667 = vmatprep.mubr.f32.mxu1 %v600_v41 }
 0x214   :  { %668 = vmatmul.mubr.f32.vlgmr.msra.gmra.mrb[0].mxu1 %v785_v38 }
 0x2e7   :  { %v830_v53 = vpop.f32.mrb[0].mxu1 }
 0x2e8   :  { %v831_v57 = vpop.f32.mrb[1].mxu1 }
 0x2e9   :  { %v832_v60 = vadd.f32 %v831_v57, %v830_v53 }
 0x2eb   :  { %v670_v49 = vadd.f32 %v832_v60, %v784_v52 }
 0x2ed   :  { %v674_v54 = vmul.f32 0.70710677, %v670_v49  ;;  %v673_v62 = vmul.f32 0.5, %v670_v49 }
 0x2ef   :  { %934 = verf.f32 %v674_v54 }
 0x2f9   :  { %v935_v61 = vpop.eup %934 }
 0x2fa   :  { %v676_v63 = vadd.f32 1.0, %v935_v61 }
 0x2fc   :  { %v677_v0 = vmul.f32 %v676_v63, %v673_v62 }
 0x2fe   :  { %865 = vmatmul.mubr.msk.f32.vlgmr.msra.gmra.mrb[4].mxu0 %vm689_vm2, %v677_v0 }
 0x3d1   :  { %v759_v2 = vpop.f32.mrb[4].mxu0 }
 0x3d2   :  { %v760_v3 = vadd.f32 %v786_v1, %v759_v2  ;;  %v866_v56 = vpop.f32.mrb[5].mxu0 }
 0x3d4   :  { %764 = vst.msk [vmem:[#allocation4] sm:$0x3] %vm763_vm3, %v760_v3 }
 0x3d5   :  { %947 = shalt.err (!%p944_p4)
}
 0x3d6   :  { %s948_s27 = scalar_lea.hbm %s1297_s7, 32 }
 0x3d7   :  { %p949_p5 = scmp.ne.s32.totalorder %s1297_s7, %s948_s27  ;;  %p952_p6 = scmp.lt.u32.totalorder %s948_s27, %s1297_s7 }
 0x3d9   :  { %p954_p7 = pnand %p952_p6, %p949_p5 }
 0x3db   :  { %957 = shalt.err (!%p954_p7)
}
 0x3dc   :  { %774 = dma.vmem_to_hbm [thread:$0]  %s772_s23, 32, %s1297_s7, [#allocation5]  }
 0x3dd   :  { %958 = dma.done.wait [#allocation5], 32  }
 0x3de   :  { %959 = vsyncadd [#allocation5], 4294967264 }
 0x3df   :  { %778 = vsyncpa [#allocation5], 1 }

</bundles_post_ra>
